<compile_context>
chip_gen: v6e
topology: v6e:2x2x1
jax: 0.10.0
libtpu: 0.0.40
codegen_flags: <defaults>
</compile_context>

<pallas_src>
import jax
import jax.numpy as jnp
from jax.experimental import pallas as pl
from jax.experimental.pallas import tpu as pltpu

# Attention2 chains attn1 (xDim->yDim) into attn2 (xDim->yDim), so xDim == yDim.
XDIM = 32
YDIM = 32
SEQ = 8
BATCH = 2


def attention2_kernel(x_ref, w_ref, b_ref, o_ref):
    # x_ref: (B, S, D)      whole batch (single grid step)
    # w_ref: (2, D, 3D)     [stage1 QKV | stage2 QKV] weights, (in, out) layout
    # b_ref: (2, 1, 3D)     matching biases
    # o_ref: (B, D)         flat output (max over the sequence axis)
    B, S, D = x_ref.shape
    inv_scale = jnp.float32(1.0 / (YDIM ** 0.5))

    def project(v, i):
        # Fused QKV projection: one (B*S, D) @ (D, 3D) matmul + bias.
        vm = v.reshape(B * S, D)
        qkv = jnp.dot(vm, w_ref[i], preferred_element_type=jnp.float32) + b_ref[i]
        return qkv.reshape(B, S, 3 * D)

    def sdpa(qkv, flat):
        Q = qkv[:, :, :D]
        K = qkv[:, :, D:2 * D]
        V = qkv[:, :, 2 * D:]
        # QK^T * (1/sqrt(yDim)); softmax over dim=-2 (query axis, per module).
        s = jnp.einsum('bqd,bkd->bqk', Q, K,
                       preferred_element_type=jnp.float32) * inv_scale
        m = jnp.max(s, axis=-2, keepdims=True)
        e = jnp.exp(s - m)
        p = e * pl.reciprocal(jnp.sum(e, axis=-2, keepdims=True), approx=True)
        o = jnp.einsum('bqk,bkd->bqd', p, V, preferred_element_type=jnp.float32)
        if flat:
            o = jnp.max(o, axis=-2)          # (B, D)
        return o

    a1 = sdpa(project(x_ref[...], 0), flat=False)   # attn1: keep (B, S, D)
    o_ref[...] = sdpa(project(a1, 1), flat=True)    # attn2: one lane-dense store


def attention2(x, w_qkv, b_qkv):
    B, S, D = x.shape
    return pl.pallas_call(
        attention2_kernel,
        out_shape=jax.ShapeDtypeStruct((B, D), jnp.float32),
        grid=(1,),
        in_specs=[
            pl.BlockSpec((B, S, D), lambda i: (0, 0, 0)),       # whole batch in one DMA
            pl.BlockSpec((2, D, 3 * D), lambda i: (0, 0, 0)),   # fused weights, resident
            pl.BlockSpec((2, 1, 3 * D), lambda i: (0, 0, 0)),   # fused biases
        ],
        out_specs=pl.BlockSpec((B, D), lambda i: (0, 0)),
        compiler_params=pltpu.CompilerParams(
            dimension_semantics=("arbitrary",)),
    )(x, w_qkv, b_qkv)


def reference(x, w_stack, b_stack):
    """Pure-JAX re-implementation of Attention2 for verification."""
    scale = YDIM ** 0.5

    def lin(v, i):
        return v @ w_stack[i] + b_stack[i]

    def sdpa(Q, K, V):
        qk = (Q @ jnp.swapaxes(K, -1, -2)) / scale
        p = jax.nn.softmax(qk, axis=-2)
        return p @ V

    a1 = sdpa(lin(x, 0), lin(x, 1), lin(x, 2))
    a2 = sdpa(lin(a1, 3), lin(a1, 4), lin(a1, 5))
    return jnp.max(a2, axis=-2)


if __name__ == "__main__":
    key = jax.random.PRNGKey(0)
    k_w, k_b, k_x = jax.random.split(key, 3)

    # Deterministic parameter init (PyTorch-Linear-style uniform bounds),
    # pre-transposed to (in, out).  Order: [Q1, K1, V1, Q2, K2, V2].
    bound = 1.0 / (XDIM ** 0.5)
    w_stack = jax.random.uniform(k_w, (6, XDIM, YDIM), jnp.float32, -bound, bound)
    b_stack = jax.random.uniform(k_b, (6, YDIM), jnp.float32, -bound, bound)

    # Fused kernel layout: per-stage QKV concatenated along the output dim.
    w_qkv = jnp.stack([
        jnp.concatenate([w_stack[0], w_stack[1], w_stack[2]], axis=1),
        jnp.concatenate([w_stack[3], w_stack[4], w_stack[5]], axis=1),
    ])                                    # (2, D, 3D)
    b_qkv = jnp.stack([
        jnp.concatenate([b_stack[0], b_stack[1], b_stack[2]]),
        jnp.concatenate([b_stack[3], b_stack[4], b_stack[5]]),
    ])[:, None, :]                        # (2, 1, 3D)

    x = jax.random.normal(k_x, (BATCH, SEQ, XDIM), jnp.float32)

    out = jax.block_until_ready(attention2(x, w_qkv, b_qkv))
    ref = reference(x, w_stack, b_stack)

    assert out.shape == (BATCH, YDIM)
    # Slightly loosened tolerance: the softmax denominator uses the EUP
    # approximate reciprocal (pl.reciprocal(approx=True)).
    assert jnp.allclose(out, ref, rtol=5e-3, atol=1e-3), "mismatch vs reference"

    print("KERNEL_OK")
</pallas_src>

<mosaic_0001>
module attributes {stable_mosaic.version = 11 : i64} {
  func.func @attention2_kernel(%arg0: i32, %arg1: memref<2x8x32xf32, #tpu.memory_space<vmem>>, %arg2: memref<2x32x96xf32, #tpu.memory_space<vmem>>, %arg3: memref<2x1x96xf32, #tpu.memory_space<vmem>>, %arg4: memref<2x32xf32, #tpu.memory_space<vmem>>) attributes {dimension_semantics = [#tpu.dimension_semantics<arbitrary>], iteration_bounds = array<i64: 1>, scalar_prefetch = 0 : i64, scratch_operands = 0 : i64, tpu.core_type = #tpu.core_type<tc>, window_params = [{pipeline_mode = #tpu.pipeline_mode<synchronous>, transform_indices = @transform_0, window_bounds = array<i64: 2, 8, 32>}, {pipeline_mode = #tpu.pipeline_mode<synchronous>, transform_indices = @transform_1, window_bounds = array<i64: 2, 32, 96>}, {pipeline_mode = #tpu.pipeline_mode<synchronous>, transform_indices = @transform_2, window_bounds = array<i64: 2, 1, 96>}, {pipeline_mode = #tpu.pipeline_mode<synchronous>, transform_indices = @transform_3, window_bounds = array<i64: 2, 32>}]} {
    %c0 = arith.constant 0 : index
    %c0_0 = arith.constant 0 : index
    %c0_1 = arith.constant 0 : index
    %0 = vector.load %arg1[%c0, %c0_0, %c0_1] : memref<2x8x32xf32, #tpu.memory_space<vmem>>, vector<2x8x32xf32>
    %1 = vector.shape_cast %0 : vector<2x8x32xf32> to vector<16x32xf32>
    %c0_2 = arith.constant 0 : index
    %c0_3 = arith.constant 0 : index
    %c0_4 = arith.constant 0 : index
    %2 = vector.load %arg2[%c0_2, %c0_3, %c0_4] : memref<2x32x96xf32, #tpu.memory_space<vmem>>, vector<1x32x96xf32>
    %3 = vector.shape_cast %2 : vector<1x32x96xf32> to vector<32x96xf32>
    %cst = arith.constant dense<0.000000e+00> : vector<16x96xf32>
    %4 = tpu.matmul %1, %3, %cst {dimension_numbers = #tpu.dot_dimension_numbers<[1], [0], [0], [1], [0, 0, 1, 1], [], []>} : vector<16x32xf32>, vector<32x96xf32>, vector<16x96xf32> -> vector<16x96xf32>
    %c0_5 = arith.constant 0 : index
    %c0_6 = arith.constant 0 : index
    %c0_7 = arith.constant 0 : index
    %5 = vector.load %arg3[%c0_5, %c0_6, %c0_7] : memref<2x1x96xf32, #tpu.memory_space<vmem>>, vector<1x1x96xf32>
    %6 = vector.shape_cast %5 : vector<1x1x96xf32> to vector<1x96xf32>
    %7 = vector.broadcast %6 : vector<1x96xf32> to vector<16x96xf32>
    %8 = arith.addf %4, %7 : vector<16x96xf32>
    %9 = vector.shape_cast %8 : vector<16x96xf32> to vector<2x8x96xf32>
    %10 = vector.extract_strided_slice %9 {offsets = [0, 0, 0], sizes = [2, 8, 32], strides = [1, 1, 1]} : vector<2x8x96xf32> to vector<2x8x32xf32>
    %11 = vector.extract_strided_slice %9 {offsets = [0, 0, 32], sizes = [2, 8, 32], strides = [1, 1, 1]} : vector<2x8x96xf32> to vector<2x8x32xf32>
    %12 = vector.extract_strided_slice %9 {offsets = [0, 0, 64], sizes = [2, 8, 32], strides = [1, 1, 1]} : vector<2x8x96xf32> to vector<2x8x32xf32>
    "tpu.trace_start"() <{level = 10 : i32, message = "bqd,bkd->bqk"}> : () -> ()
    %cst_8 = arith.constant dense<0.000000e+00> : vector<2x8x8xf32>
    %13 = tpu.matmul %10, %11, %cst_8 {dimension_numbers = #tpu.dot_dimension_numbers<[2], [2], [1], [1], [0, 0, 0, 1, 1, 1], [0], [0]>} : vector<2x8x32xf32>, vector<2x8x32xf32>, vector<2x8x8xf32> -> vector<2x8x8xf32>
    "tpu.trace_stop"() : () -> ()
    %cst_9 = arith.constant 0.176776692 : f32
    %14 = vector.broadcast %cst_9 : f32 to vector<2x8x8xf32>
    %15 = arith.mulf %13, %14 : vector<2x8x8xf32>
    %cst_10 = arith.constant dense<0xFF800000> : vector<2x8xf32>
    %16 = vector.multi_reduction <maximumf>, %15, %cst_10 [1] : vector<2x8x8xf32> to vector<2x8xf32>
    %17 = vector.shape_cast %16 : vector<2x8xf32> to vector<2x1x8xf32>
    %18 = vector.broadcast %17 : vector<2x1x8xf32> to vector<2x8x8xf32>
    %19 = arith.subf %15, %18 : vector<2x8x8xf32>
    %20 = math.exp %19 : vector<2x8x8xf32>
    %cst_11 = arith.constant dense<0.000000e+00> : vector<2x8xf32>
    %21 = vector.multi_reduction <add>, %20, %cst_11 [1] : vector<2x8x8xf32> to vector<2x8xf32>
    %22 = vector.shape_cast %21 : vector<2x8xf32> to vector<2x1x8xf32>
    %23 = tpu.reciprocal %22 {approx = true} : vector<2x1x8xf32> -> vector<2x1x8xf32>
    %24 = vector.broadcast %23 : vector<2x1x8xf32> to vector<2x8x8xf32>
    %25 = arith.mulf %20, %24 : vector<2x8x8xf32>
    "tpu.trace_start"() <{level = 10 : i32, message = "bqk,bkd->bqd"}> : () -> ()
    %cst_12 = arith.constant dense<0.000000e+00> : vector<2x8x32xf32>
    %26 = tpu.matmul %25, %12, %cst_12 {dimension_numbers = #tpu.dot_dimension_numbers<[2], [1], [1], [2], [0, 0, 0, 1, 1, 2], [0], [0]>} : vector<2x8x8xf32>, vector<2x8x32xf32>, vector<2x8x32xf32> -> vector<2x8x32xf32>
    "tpu.trace_stop"() : () -> ()
    %27 = vector.shape_cast %26 : vector<2x8x32xf32> to vector<16x32xf32>
    %c1 = arith.constant 1 : index
    %c0_13 = arith.constant 0 : index
    %c0_14 = arith.constant 0 : index
    %28 = vector.load %arg2[%c1, %c0_13, %c0_14] : memref<2x32x96xf32, #tpu.memory_space<vmem>>, vector<1x32x96xf32>
    %29 = vector.shape_cast %28 : vector<1x32x96xf32> to vector<32x96xf32>
    %cst_15 = arith.constant dense<0.000000e+00> : vector<16x96xf32>
    %30 = tpu.matmul %27, %29, %cst_15 {dimension_numbers = #tpu.dot_dimension_numbers<[1], [0], [0], [1], [0, 0, 1, 1], [], []>} : vector<16x32xf32>, vector<32x96xf32>, vector<16x96xf32> -> vector<16x96xf32>
    %c1_16 = arith.constant 1 : index
    %c0_17 = arith.constant 0 : index
    %c0_18 = arith.constant 0 : index
    %31 = vector.load %arg3[%c1_16, %c0_17, %c0_18] : memref<2x1x96xf32, #tpu.memory_space<vmem>>, vector<1x1x96xf32>
    %32 = vector.shape_cast %31 : vector<1x1x96xf32> to vector<1x96xf32>
    %33 = vector.broadcast %32 : vector<1x96xf32> to vector<16x96xf32>
    %34 = arith.addf %30, %33 : vector<16x96xf32>
    %35 = vector.shape_cast %34 : vector<16x96xf32> to vector<2x8x96xf32>
    %36 = vector.extract_strided_slice %35 {offsets = [0, 0, 0], sizes = [2, 8, 32], strides = [1, 1, 1]} : vector<2x8x96xf32> to vector<2x8x32xf32>
    %37 = vector.extract_strided_slice %35 {offsets = [0, 0, 32], sizes = [2, 8, 32], strides = [1, 1, 1]} : vector<2x8x96xf32> to vector<2x8x32xf32>
    %38 = vector.extract_strided_slice %35 {offsets = [0, 0, 64], sizes = [2, 8, 32], strides = [1, 1, 1]} : vector<2x8x96xf32> to vector<2x8x32xf32>
    "tpu.trace_start"() <{level = 10 : i32, message = "bqd,bkd->bqk"}> : () -> ()
    %cst_19 = arith.constant dense<0.000000e+00> : vector<2x8x8xf32>
    %39 = tpu.matmul %36, %37, %cst_19 {dimension_numbers = #tpu.dot_dimension_numbers<[2], [2], [1], [1], [0, 0, 0, 1, 1, 1], [0], [0]>} : vector<2x8x32xf32>, vector<2x8x32xf32>, vector<2x8x8xf32> -> vector<2x8x8xf32>
    "tpu.trace_stop"() : () -> ()
    %cst_20 = arith.constant 0.176776692 : f32
    %40 = vector.broadcast %cst_20 : f32 to vector<2x8x8xf32>
    %41 = arith.mulf %39, %40 : vector<2x8x8xf32>
    %cst_21 = arith.constant dense<0xFF800000> : vector<2x8xf32>
    %42 = vector.multi_reduction <maximumf>, %41, %cst_21 [1] : vector<2x8x8xf32> to vector<2x8xf32>
    %43 = vector.shape_cast %42 : vector<2x8xf32> to vector<2x1x8xf32>
    %44 = vector.broadcast %43 : vector<2x1x8xf32> to vector<2x8x8xf32>
    %45 = arith.subf %41, %44 : vector<2x8x8xf32>
    %46 = math.exp %45 : vector<2x8x8xf32>
    %cst_22 = arith.constant dense<0.000000e+00> : vector<2x8xf32>
    %47 = vector.multi_reduction <add>, %46, %cst_22 [1] : vector<2x8x8xf32> to vector<2x8xf32>
    %48 = vector.shape_cast %47 : vector<2x8xf32> to vector<2x1x8xf32>
    %49 = tpu.reciprocal %48 {approx = true} : vector<2x1x8xf32> -> vector<2x1x8xf32>
    %50 = vector.broadcast %49 : vector<2x1x8xf32> to vector<2x8x8xf32>
    %51 = arith.mulf %46, %50 : vector<2x8x8xf32>
    "tpu.trace_start"() <{level = 10 : i32, message = "bqk,bkd->bqd"}> : () -> ()
    %cst_23 = arith.constant dense<0.000000e+00> : vector<2x8x32xf32>
    %52 = tpu.matmul %51, %38, %cst_23 {dimension_numbers = #tpu.dot_dimension_numbers<[2], [1], [1], [2], [0, 0, 0, 1, 1, 2], [0], [0]>} : vector<2x8x8xf32>, vector<2x8x32xf32>, vector<2x8x32xf32> -> vector<2x8x32xf32>
    "tpu.trace_stop"() : () -> ()
    %cst_24 = arith.constant dense<0xFF800000> : vector<2x32xf32>
    %53 = vector.multi_reduction <maximumf>, %52, %cst_24 [1] : vector<2x8x32xf32> to vector<2x32xf32>
    %c0_25 = arith.constant 0 : index
    %c0_26 = arith.constant 0 : index
    %54 = vector.load %arg4[%c0_25, %c0_26] : memref<2x32xf32, #tpu.memory_space<vmem>>, vector<2x32xf32>
    tpu.vector_store %arg4[%c0_25, %c0_26], %53 {strides = array<i32>} : memref<2x32xf32, #tpu.memory_space<vmem>>, vector<2x32xf32>,
    return
  }
  func.func @transform_0(%arg0: i32) -> (i32, i32, i32) {
    %c0_i32 = arith.constant 0 : i32
    %c0_i32_0 = arith.constant 0 : i32
    %c0_i32_1 = arith.constant 0 : i32
    %c0_i32_2 = arith.constant 0 : i32
    return %c0_i32, %c0_i32_0, %c0_i32_1 : i32, i32, i32
  }
  func.func @transform_1(%arg0: i32) -> (i32, i32, i32) {
    %c0_i32 = arith.constant 0 : i32
    %c0_i32_0 = arith.constant 0 : i32
    %c0_i32_1 = arith.constant 0 : i32
    %c0_i32_2 = arith.constant 0 : i32
    return %c0_i32, %c0_i32_0, %c0_i32_1 : i32, i32, i32
  }
  func.func @transform_2(%arg0: i32) -> (i32, i32, i32) {
    %c0_i32 = arith.constant 0 : i32
    %c0_i32_0 = arith.constant 0 : i32
    %c0_i32_1 = arith.constant 0 : i32
    %c0_i32_2 = arith.constant 0 : i32
    return %c0_i32, %c0_i32_0, %c0_i32_1 : i32, i32, i32
  }
  func.func @transform_3(%arg0: i32) -> (i32, i32) {
    %c0_i32 = arith.constant 0 : i32
    %c0_i32_0 = arith.constant 0 : i32
    %c0_i32_1 = arith.constant 0 : i32
    return %c0_i32, %c0_i32_0 : i32, i32
  }
}

</mosaic_0001>

<bundles_post_ra>
// kernel: tpu_custom_call.1
= control target key start
LH: loop header
LB: loop body
LE: loop exit
PB: predicated region body
PF: predicated region fallthrough
CT: control target
= control target key end

     0   :  { %8 = vsyncpa [#allocation3], 0  ;;  %s1264_s0 = inlined_call_operand.hbm [shape: f32[2,8,32], index: 0, kind: input, shape index: {}]   ;;  %s1265_s1 = inlined_call_operand.hbm [shape: f32[2,32,96], index: 1, kind: input, shape index: {}]   ;;  %s1266_s2 = inlined_call_operand.vmem [shape: f32[2,1,96], index: 2, kind: input, shape index: {}]   ;;  %s1267_s3 = inlined_call_operand.hbm [shape: f32[2,32], index: 3, kind: output, shape index: {}]  }
   0x1   :  { %9 = vsyncpa [#allocation6], 0 }
   0x2   :  { %10 = vsyncpa [#allocation4], 0  ;;  %s1162_s12 = smov [#allocation2]  }
   0x3   :  { %s16_s13 = sshll.u32 %s1162_s12, 4  ;;  %s17_s13 = int_to_ptr.vmem [resolvable:$true] %s16_s13 }
   0x4   :  { %s1104_s14 = scalar_lea.vmem %s17_s13, 256  ;;  %p1109_p1 = scmp.lt.s32.totalorder %s17_s13, %s17_s13 }
   0x5   :  { %p1105_p0 = scmp.ne.s32.totalorder %s17_s13, %s1104_s14  ;;  %p1110_p2 = scmp.lt.s32.totalorder %s1104_s14, %s1104_s14 }
   0x7   :  { %p1111_p3 = por %p1110_p2, %p1109_p1 }
   0x9   :  { %p1112_p4 = pnand %p1111_p3, %p1105_p0 }
   0xb   :  { %1115 = shalt.err (!%p1112_p4)
}
   0xc   :  { %s1163_s15 = smov 128   ;;  %s1164_s16 = smov 8  }
   0xd   :  { %22 = dma.hbm_to_vmem [thread:$0]  %s1264_s0, 256, %s17_s13, [#allocation3], %s1163_s15, %s1163_s15, %s1164_s16  }
   0xe   :  { %s1165_s19 = smov [#allocation5]  }
   0xf   :  { %s28_s20 = sshll.u32 %s1165_s19, 4  ;;  %s29_s20 = int_to_ptr.vmem [resolvable:$true] %s28_s20 }
  0x10   :  { %s1124_s21 = scalar_lea.vmem %s29_s20, 1024  ;;  %p1129_p6 = scmp.lt.s32.totalorder %s29_s20, %s29_s20 }
  0x11   :  { %p1125_p5 = scmp.ne.s32.totalorder %s29_s20, %s1124_s21  ;;  %p1130_p7 = scmp.lt.s32.totalorder %s1124_s21, %s1124_s21 }
  0x13   :  { %p1131_p8 = por %p1130_p7, %p1129_p6 }
  0x15   :  { %p1132_p9 = pnand %p1131_p8, %p1125_p5 }
  0x17   :  { %1135 = shalt.err (!%p1132_p9)
}
  0x18   :  { %34 = dma.hbm_to_vmem [thread:$0]  %s1265_s1, 1024, %s29_s20, [#allocation6], %s1163_s15, %s1163_s15, %s1164_s16  }
  0x19   :  { %1156 = dma.done.wait [#allocation3], 256  }
  0x1a   :  { %1157 = vsyncadd [#allocation3], 4294967040 }
  0x1b   :  { %1158 = dma.done.wait [#allocation6], 1024  }
  0x1c   :  { %1159 = vsyncadd [#allocation6], 4294966272  ;;  %vm56_vm0 = vcmask 261120   ;;  %v48_v0 = vld [vmem:[#allocation5 + $0x18] sm:$0xff]  ;;  %v47_v1 = vld [vmem:[#allocation5 + $0x10] sm:$0xff]  ;;  %v1166_v6 = vmov 0.0  }
  0x1d   :  { %1009 = vmatprep.subr.mxu0 %v48_v0  ;;  %v43_v2 = vld [vmem:[#allocation2] sm:$0xff]  ;;  %v46_v3 = vld [vmem:[#allocation5 + $0x8] sm:$0xff]  ;;  %v45_v4 = vld [vmem:[#allocation5] sm:$0xff]  ;;  %1020 = vmatprep.subr.mxu1 %v1166_v6  ;;  %vm1167_vm1 = vmmov 0   ;;  %s1168_s24 = smov 64   ;;  %s1169_s25 = smov 96  }
  0x1e   :  { %1010 = vmatpush3.msra.mxu0 %v48_v0  ;;  %1017 = vmatprep.mubr.msk.f32.mxu0 %vm56_vm0, %v43_v2  ;;  %v44_v5 = vld [vmem:[#allocation2 + $0x8] sm:$0xff]  ;;  %v962_v8 = vld [vmem:[%s1266_s2] ss:$0 sm:$0xff]  ;;  %vm294_vm2 = vcmask 64512   ;;  %v487_v62 = vld [vmem:[#allocation5 + $0x28] sm:$0xff]  ;;  %vm941_vm3 = vcmask 1041409  }
  0x1f   :  { %1011 = vmatprep.subr.mxu0 %v47_v1  ;;  %1022 = vmatprep.mubr.msk.f32.mxu1 %vm1167_vm1, %v1166_v6  ;;  %v489_v16 = vld [vmem:[#allocation5 + $0x38] sm:$0xff]  ;;  %v488_v59 = vld [vmem:[#allocation5 + $0x30] sm:$0xff]  ;;  %v486_v63 = vld [vmem:[#allocation5 + $0x20] sm:$0xff]  ;;  %vm944_vm4 = vcmask 254976  }
  0x20   :  { %1012 = vmatpush3.msra.mxu0 %v47_v1 }
  0x21   :  { %1013 = vmatprep.subr.mxu0 %v46_v3 }
  0x22   :  { %1014 = vmatpush3.msra.mxu0 %v46_v3 }
  0x23   :  { %1015 = vmatprep.subr.mxu0 %v45_v4 }
  0x24   :  { %1016 = vmatpush3.msra.mxu0 %v45_v4  ;;  %v972_v4 = vld [vmem:[%s1266_s2 + $0x1] ss:$0 sm:$0xff]  ;;  %s1170_s2 = smov [#allocation7]  }
  0x25   :  { %1018 = vmatmul.mubr.msk.f32.vlgmr.msra.gmra.mxu0 %vm56_vm0, %v44_v5  ;;  %1030 = vmatprep.subr.mxu0 %v1166_v6  ;;  %s952_s28 = sshll.u32 %s1170_s2, 4  ;;  %s953_s28 = int_to_ptr.vmem [resolvable:$true] %s952_s28 }
  0x26   :  { %1032 = vmatprep.mubr.msk.f32.mxu0 %vm1167_vm1, %v1166_v6  ;;  %s1136_s29 = scalar_lea.vmem %s953_s28, 32  ;;  %p1141_p11 = scmp.lt.s32.totalorder %s953_s28, %s953_s28 }
  0x27   :  { %p1137_p10 = scmp.ne.s32.totalorder %s953_s28, %s1136_s29  ;;  %p1142_p12 = scmp.lt.s32.totalorder %s1136_s29, %s1136_s29 }
  0x29   :  { %p1143_p13 = por %p1142_p12, %p1141_p11 }
  0x2b   :  { %p1144_p0 = pnand %p1143_p13, %p1137_p10 }
  0xe5   :  { %v1019_v7 = vpop.f32.mrf.mxu0 }
  0xe6   :  { %v135_v11 = vadd.f32 %v1019_v7, %v962_v8 }
  0xe7   :  { %v129_v9 = vpop.f32.mrf.mxu0 }
  0xe8   :  { %v130_v10 = vadd.f32 %v962_v8, %v129_v9 }
  0xea   :  { %333 = vrot.lane.b32.xlu1 %v130_v10, %s1168_s24  ;;  %139 = vrot.lane.b32.xlu0 %v130_v10, %s1169_s25 }
  0xee   :  { %409 = vrot.lane.b32.xlu1 %v135_v11, %s1168_s24  ;;  %216 = vrot.lane.b32.xlu0 %v135_v11, %s1169_s25 }
 0x15c   :  { %v334_v12 = vpop.permute.xlu1 %333  ;;  %v140_v13 = vpop.permute.xlu0 %139 }
 0x15d   :  { %1021 = vmatpush3.xpose.msk.msra.mxu1 %vm56_vm0, %v140_v13  ;;  %1031 = vmatpush3.msra.mxu0 %v334_v12 }
 0x15e   :  { %1025 = vmatprep.subr.mxu1 %v1166_v6  ;;  %1040 = vmatprep.subr.mxu0 %v489_v16 }
 0x160   :  { %1023 = vmatmul.mubr.msk.f32.vlgmr.msra.gmra.mxu1 %vm56_vm0, %v130_v10  ;;  %v217_v14 = vpop.permute.xlu0 %216  ;;  %v410_v15 = vpop.permute.xlu1 %409 }
 0x161   :  { %1026 = vmatpush3.xpose.msk.msra.mxu1 %vm56_vm0, %v217_v14  ;;  %1027 = vmatprep.mubr.msk.f32.mxu1 %vm1167_vm1, %v1166_v6 }
 0x162   :  { %1035 = vmatprep.subr.mxu1 %v1166_v6 }
 0x164   :  { %1028 = vmatmul.mubr.msk.f32.vlgmr.msra.gmra.mxu1 %vm56_vm0, %v135_v11 }
 0x165   :  { %1036 = vmatpush3.msra.mxu1 %v410_v15  ;;  %1037 = vmatprep.mubr.msk.f32.mxu1 %vm1167_vm1, %v1166_v6 }
 0x166   :  { %1051 = vmatprep.subr.mxu1 %v1166_v6 }
 0x220   :  { %v211_v17 = vpop.f32.mrf.mxu1 }
 0x221   :  { %v292_v18 = vmul.f32 0.17677669, %v211_v17 }
 0x222   :  { %v1024_v19 = vpop.f32.mrf.mxu1 }
 0x223   :  { %v295_v20 = vsel %vm294_vm2, %v292_v18, -inf }
 0x224   :  { %v296_v21 = vrot.slane %v295_v20, 4  ;;  %v288_v22 = vpop.f32.mrf.mxu1 }
 0x225   :  { %v293_v23 = vmul.f32 0.17677669, %v288_v22 }
 0x226   :  { %v297_v24 = vmax.f32 %v295_v20, %v296_v21  ;;  %v1029_v25 = vpop.f32.mrf.mxu1 }
 0x227   :  { %v302_v26 = vsel %vm294_vm2, %v293_v23, -inf }
 0x228   :  { %v298_v27 = vrot.slane %v297_v24, 2  ;;  %v303_v28 = vrot.slane %v302_v26, 4 }
 0x22a   :  { %v299_v29 = vmax.f32 %v297_v24, %v298_v27  ;;  %v304_v30 = vmax.f32 %v302_v26, %v303_v28 }
 0x22c   :  { %v300_v31 = vrot.slane %v299_v29, 1  ;;  %v305_v32 = vrot.slane %v304_v30, 2 }
 0x22e   :  { %v301_v33 = vmax.f32 %v299_v29, %v300_v31  ;;  %v306_v34 = vmax.f32 %v304_v30, %v305_v32 }
 0x230   :  { %v309_v35 = vsub.f32 %v292_v18, %v301_v33  ;;  %v307_v36 = vrot.slane %v306_v34, 1 }
 0x232   :  { %v311_v37 = vmul.f32 1.442695, %v309_v35  ;;  %v308_v38 = vmax.f32 %v306_v34, %v307_v36 }
 0x234   :  { %1080 = vpow2.f32 %v311_v37  ;;  %v310_v39 = vsub.f32 %v293_v23, %v308_v38 }
 0x236   :  { %v313_v40 = vmul.f32 1.442695, %v310_v39 }
 0x238   :  { %1082 = vpow2.f32 %v313_v40 }
 0x241   :  { %v1081_v41 = vpop.eup %1080 }
 0x242   :  { %v315_v42 = vsel %vm294_vm2, %v1081_v41, 0.0 }
 0x243   :  { %v316_v43 = vrot.slane %v315_v42, 4 }
 0x245   :  { %v1083_v44 = vpop.eup %1082  ;;  %v317_v45 = vadd.f32 %v316_v43, %v315_v42 }
 0x246   :  { %v322_v46 = vsel %vm294_vm2, %v1083_v44, 0.0 }
 0x247   :  { %v318_v47 = vrot.slane %v317_v45, 2  ;;  %v323_v48 = vrot.slane %v322_v46, 4 }
 0x249   :  { %v319_v49 = vadd.f32 %v318_v47, %v317_v45  ;;  %v324_v50 = vadd.f32 %v323_v48, %v322_v46 }
 0x24b   :  { %v320_v51 = vrot.slane %v319_v49, 1  ;;  %v325_v52 = vrot.slane %v324_v50, 2 }
 0x24d   :  { %v321_v53 = vadd.f32 %v320_v51, %v319_v49  ;;  %v326_v54 = vadd.f32 %v325_v52, %v324_v50 }
 0x24f   :  { %1084 = vrcp.f32 %v321_v53  ;;  %v327_v55 = vrot.slane %v326_v54, 1 }
 0x251   :  { %v328_v56 = vadd.f32 %v327_v55, %v326_v54 }
 0x253   :  { %1086 = vrcp.f32 %v328_v56 }
 0x25c   :  { %v1085_v57 = vpop.eup %1084 }
 0x25d   :  { %v331_v58 = vmul.f32 %v1085_v57, %v1081_v41 }
 0x25f   :  { %1033 = vmatmul.mubr.msk.f32.vlgmr.msra.gmra.mxu0 %vm294_vm2, %v331_v58 }
 0x260   :  { %v1087_v60 = vpop.eup %1086  ;;  %1041 = vmatpush3.msra.mxu0 %v489_v16 }
 0x261   :  { %v332_v61 = vmul.f32 %v1087_v60, %v1083_v44  ;;  %1042 = vmatprep.subr.mxu0 %v488_v59 }
 0x262   :  { %1043 = vmatpush3.msra.mxu0 %v488_v59 }
 0x263   :  { %1038 = vmatmul.mubr.msk.f32.vlgmr.msra.gmra.mxu1 %vm294_vm2, %v332_v61  ;;  %1044 = vmatprep.subr.mxu0 %v487_v62 }
 0x264   :  { %1053 = vmatprep.mubr.msk.f32.mxu1 %vm1167_vm1, %v1166_v6  ;;  %1045 = vmatpush3.msra.mxu0 %v487_v62 }
 0x265   :  { %1046 = vmatprep.subr.mxu0 %v486_v63 }
 0x266   :  { %1047 = vmatpush3.msra.mxu0 %v486_v63 }
 0x267   :  { %1061 = vmatprep.subr.mxu0 %v1166_v6 }
 0x31f   :  { %v405_v0 = vpop.f32.mrf.mxu0 }
 0x320   :  { %1048 = vmatprep.mubr.msk.f32.mxu0 %vm56_vm0, %v405_v0 }
 0x321   :  { %v1034_v1 = vpop.f32.mrf.mxu0 }
 0x323   :  { %v481_v2 = vpop.f32.mrf.mxu1 }
 0x324   :  { %1049 = vmatmul.mubr.msk.f32.vlgmr.msra.gmra.mxu0 %vm56_vm0, %v481_v2 }
 0x325   :  { %v1039_v3 = vpop.f32.mrf.mxu1  ;;  %1063 = vmatprep.mubr.msk.f32.mxu0 %vm1167_vm1, %v1166_v6 }
 0x3e4   :  { %v1050_v5 = vpop.f32.mrf.mxu0 }
 0x3e5   :  { %v576_v7 = vadd.f32 %v1050_v5, %v972_v4 }
 0x3e6   :  { %v570_v8 = vpop.f32.mrf.mxu0 }
 0x3e7   :  { %v571_v9 = vadd.f32 %v972_v4, %v570_v8  ;;  %657 = vrot.lane.b32.xlu1 %v576_v7, %s1169_s25 }
 0x3e9   :  { %580 = vrot.lane.b32.xlu0 %v571_v9, %s1169_s25 }
 0x3eb   :  { %849 = vrot.lane.b32.xlu1 %v576_v7, %s1168_s24 }
 0x3ed   :  { %773 = vrot.lane.b32.xlu0 %v571_v9, %s1168_s24 }
 0x459   :  { %v658_v11 = vpop.permute.xlu1 %657 }
 0x45b   :  { %v581_v10 = vpop.permute.xlu0 %580 }
 0x45c   :  { %1052 = vmatpush3.xpose.msk.msra.mxu1 %vm56_vm0, %v581_v10 }
 0x45d   :  { %1056 = vmatprep.subr.mxu1 %v1166_v6  ;;  %v850_v13 = vpop.permute.xlu1 %849 }
 0x45f   :  { %1054 = vmatmul.mubr.msk.f32.vlgmr.msra.gmra.mxu1 %vm56_vm0, %v571_v9  ;;  %v774_v12 = vpop.permute.xlu0 %773 }
 0x460   :  { %1057 = vmatpush3.xpose.msk.msra.mxu1 %vm56_vm0, %v658_v11  ;;  %1062 = vmatpush3.msra.mxu0 %v774_v12 }
 0x461   :  { %1058 = vmatprep.mubr.msk.f32.mxu1 %vm1167_vm1, %v1166_v6  ;;  %1066 = vmatprep.subr.mxu1 %v1166_v6 }
 0x463   :  { %1059 = vmatmul.mubr.msk.f32.vlgmr.msra.gmra.mxu1 %vm56_vm0, %v576_v7 }
 0x464   :  { %1067 = vmatpush3.msra.mxu1 %v850_v13  ;;  %1068 = vmatprep.mubr.msk.f32.mxu1 %vm1167_vm1, %v1166_v6 }
 0x51f   :  { %v652_v14 = vpop.f32.mrf.mxu1 }
 0x520   :  { %v733_v15 = vmul.f32 0.17677669, %v652_v14 }
 0x521   :  { %v1055_v16 = vpop.f32.mrf.mxu1 }
 0x522   :  { %v735_v17 = vsel %vm294_vm2, %v733_v15, -inf }
 0x523   :  { %v736_v18 = vrot.slane %v735_v17, 4  ;;  %v729_v19 = vpop.f32.mrf.mxu1 }
 0x524   :  { %v734_v20 = vmul.f32 0.17677669, %v729_v19 }
 0x525   :  { %v737_v21 = vmax.f32 %v735_v17, %v736_v18  ;;  %v1060_v22 = vpop.f32.mrf.mxu1 }
 0x526   :  { %v742_v23 = vsel %vm294_vm2, %v734_v20, -inf }
 0x527   :  { %v738_v24 = vrot.slane %v737_v21, 2  ;;  %v743_v25 = vrot.slane %v742_v23, 4 }
 0x529   :  { %v739_v26 = vmax.f32 %v737_v21, %v738_v24  ;;  %v744_v27 = vmax.f32 %v742_v23, %v743_v25 }
 0x52b   :  { %v740_v28 = vrot.slane %v739_v26, 1  ;;  %v745_v29 = vrot.slane %v744_v27, 2 }
 0x52d   :  { %v741_v30 = vmax.f32 %v739_v26, %v740_v28  ;;  %v746_v6 = vmax.f32 %v744_v27, %v745_v29 }
 0x52f   :  { %v749_v31 = vsub.f32 %v733_v15, %v741_v30  ;;  %v747_v32 = vrot.slane %v746_v6, 1 }
 0x531   :  { %v751_v33 = vmul.f32 1.442695, %v749_v31  ;;  %v748_v34 = vmax.f32 %v746_v6, %v747_v32 }
 0x533   :  { %1088 = vpow2.f32 %v751_v33  ;;  %v750_v35 = vsub.f32 %v734_v20, %v748_v34 }
 0x535   :  { %v753_v36 = vmul.f32 1.442695, %v750_v35 }
 0x537   :  { %1090 = vpow2.f32 %v753_v36 }
 0x540   :  { %v1089_v37 = vpop.eup %1088 }
 0x541   :  { %v755_v38 = vsel %vm294_vm2, %v1089_v37, 0.0 }
 0x542   :  { %v756_v39 = vrot.slane %v755_v38, 4 }
 0x544   :  { %v1091_v40 = vpop.eup %1090  ;;  %v757_v41 = vadd.f32 %v756_v39, %v755_v38 }
 0x545   :  { %v762_v42 = vsel %vm294_vm2, %v1091_v40, 0.0 }
 0x546   :  { %v758_v43 = vrot.slane %v757_v41, 2  ;;  %v763_v44 = vrot.slane %v762_v42, 4 }
 0x548   :  { %v759_v45 = vadd.f32 %v758_v43, %v757_v41  ;;  %v764_v46 = vadd.f32 %v763_v44, %v762_v42 }
 0x54a   :  { %v760_v47 = vrot.slane %v759_v45, 1  ;;  %v765_v48 = vrot.slane %v764_v46, 2 }
 0x54c   :  { %v761_v49 = vadd.f32 %v760_v47, %v759_v45  ;;  %v766_v50 = vadd.f32 %v765_v48, %v764_v46 }
 0x54e   :  { %1092 = vrcp.f32 %v761_v49  ;;  %v767_v51 = vrot.slane %v766_v50, 1 }
 0x550   :  { %v768_v52 = vadd.f32 %v767_v51, %v766_v50 }
 0x552   :  { %1094 = vrcp.f32 %v768_v52 }
 0x55b   :  { %v1093_v53 = vpop.eup %1092 }
 0x55c   :  { %v771_v54 = vmul.f32 %v1093_v53, %v1089_v37 }
 0x55e   :  { %1064 = vmatmul.mubr.msk.f32.vlgmr.msra.gmra.mxu0 %vm294_vm2, %v771_v54 }
 0x55f   :  { %v1095_v55 = vpop.eup %1094 }
 0x560   :  { %v772_v56 = vmul.f32 %v1095_v55, %v1091_v40 }
 0x562   :  { %1069 = vmatmul.mubr.msk.f32.vlgmr.msra.gmra.mxu1 %vm294_vm2, %v772_v56 }
 0x61e   :  { %v845_v57 = vpop.f32.mrf.mxu0 }
 0x61f   :  { %v925_v58 = vsel %vm56_vm0, %v845_v57, -inf }
 0x620   :  { %v926_v59 = vrot.slane %v925_v58, 4  ;;  %v1065_v60 = vpop.f32.mrf.mxu0 }
 0x622   :  { %v927_v61 = vmax.f32 %v925_v58, %v926_v59  ;;  %v921_v62 = vpop.f32.mrf.mxu1 }
 0x623   :  { %v932_v63 = vsel %vm56_vm0, %v921_v62, -inf }
 0x624   :  { %v928_v0 = vrot.slane %v927_v61, 2  ;;  %v933_v1 = vrot.slane %v932_v63, 4  ;;  %v1070_v2 = vpop.f32.mrf.mxu1 }
 0x626   :  { %v929_v3 = vmax.f32 %v927_v61, %v928_v0  ;;  %v934_v4 = vmax.f32 %v932_v63, %v933_v1 }
 0x628   :  { %v935_v5 = vrot.slane %v934_v4, 2  ;;  %v930_v7 = vrot.slane %v929_v3, 1 }
 0x62a   :  { %v936_v8 = vmax.f32 %v934_v4, %v935_v5  ;;  %v931_v10 = vmax.f32 %v929_v3, %v930_v7 }
 0x62c   :  { %v937_v9 = vrot.slane %v936_v8, 1 }
 0x62e   :  { %v938_v11 = vmax.f32 %v936_v8, %v937_v9 }
 0x630   :  { %v942_v12 = vsel %vm941_vm3, %v938_v11, %v931_v10 }
 0x631   :  { %945 = vst.msk [vmem:[#allocation7] sm:$0x3] %vm944_vm4, %v942_v12 }
 0x632   :  { %1147 = shalt.err (!%p1144_p0)
}
 0x633   :  { %955 = dma.vmem_to_hbm [thread:$0]  %s953_s28, 32, %s1267_s3, [#allocation4]  }
 0x634   :  { %1160 = dma.done.wait [#allocation4], 32  }
 0x635   :  { %1161 = vsyncadd [#allocation4], 4294967264 }
 0x636   :  { %959 = vsyncpa [#allocation3], 1 }
 0x637   :  { %960 = vsyncpa [#allocation6], 1 }
 0x638   :  { %961 = vsyncpa [#allocation4], 1 }

</bundles_post_ra>
